<compile_context>
chip_gen: v5e
topology: v5e:2x2
jax: 0.10.0
libtpu: 0.0.40
codegen_flags: <defaults>
</compile_context>

<pallas_src>
import functools

import jax
import jax.numpy as jnp
from jax import lax
from jax.experimental import pallas as pl
from jax.experimental.pallas import tpu as pltpu


def _make_kernel(H, W, K, Cin, Cout, N, num_conv_layers):
    """N = images_per_step * H * W; every activation is a lane-dense [C, N] tile."""
    p = K // 2

    def kernel(*refs):
        if num_conv_layers == 2:
            (col_ref, row_ref, x_ref, c1_w_ref, c1_b_ref,
             dw_w_ref, dw_b_ref, pw_w_ref, pw_b_ref, o_ref) = refs
        else:
            (col_ref, row_ref, x_ref,
             dw_w_ref, dw_b_ref, pw_w_ref, pw_b_ref, o_ref) = refs

        col = col_ref[...]                      # [1, N] int32 within-row column index
        row = row_ref[...]                      # [1, N] int32 within-image row index
        x = x_ref[...]                          # [Cin, N] f32 lane-dense input

        # f32 border masks implementing the zero "same" padding, factorised per shift:
        # tap (dh, dw) mask = rowm[dh] * colm[dw] (identity when the shift is 0).
        colm = {d: ((col < (W - d)) if d > 0 else (col >= -d)).astype(jnp.float32)
                for d in range(-p, p + 1) if d != 0}
        rowm = {d: ((row < (H - d)) if d > 0 else (row >= -d)).astype(jnp.float32)
                for d in range(-p, p + 1) if d != 0}

        def tap_loop(a, combine):
            """sum over the K*K taps of combine(tap_index, shifted+masked view of a)."""
            acc = None
            for dh in range(-p, p + 1):
                # row shift: one lane roll of the whole tile + row-border mask.
                ar = a if dh == 0 else pltpu.roll(a, (-(dh * W)) % N, axis=1)
                if dh != 0:
                    ar = ar * rowm[dh]
                for dw in range(-p, p + 1):
                    # column shift: one more lane roll + column-border mask.
                    v = ar if dw == 0 else pltpu.roll(ar, (-dw) % N, axis=1)
                    if dw != 0:
                        v = v * colm[dw]
                    t = (dh + p) * K + (dw + p)
                    term = combine(t, v)
                    acc = term if acc is None else acc + term
            return acc

        a = jnp.maximum(x, 0.0)                 # relu(x)

        if num_conv_layers == 2:
            # conv1: full KxK Cin->Cin conv.  Contraction K*K*Cin with M=Cin=4 is an
            # MXU-degenerate matmul, so it is expanded into VPU broadcast-MACs (f32),
            # with no im2col scratch round trip.
            w1 = c1_w_ref[...]                  # [Cin, K*K*Cin], col t*Cin+ci

            def conv1_combine(t, v):
                s = None
                for ci in range(Cin):
                    j = t * Cin + ci
                    term = w1[:, j:j + 1] * v[ci:ci + 1, :]    # [Cin,1] x [1,N]
                    s = term if s is None else s + term
                return s

            conv1 = tap_loop(a, conv1_combine) + c1_b_ref[...]
            a = jnp.maximum(conv1, 0.0)         # relu(conv1(relu(x)))

        # depthwise KxK conv: per-channel tap-accumulated VPU MAC.
        dww = dw_w_ref[...]                     # [Cin, K*K]
        dw_out = tap_loop(a, lambda t, v: dww[:, t:t + 1] * v) + dw_b_ref[...]

        res = dw_out + x                        # residual uses the original x

        # pointwise 1x1 conv (Cout x Cin = 24 terms): broadcast MACs on the VPU.
        pww = pw_w_ref[...]                     # [Cout, Cin]
        out = None
        for ci in range(Cin):
            term = pww[:, ci:ci + 1] * res[ci:ci + 1, :]
            out = term if out is None else out + term
        o_ref[...] = (out + pw_b_ref[...]).astype(o_ref.dtype)   # lane-dense store

    return kernel


@functools.partial(jax.jit, static_argnames=("kernel_size", "num_conv_layers"))
def res_conv_block(x_nchw, params, kernel_size=5, num_conv_layers=1):
    """Pallas ResConvBlock. x_nchw: [B, Cin, H, W] float32. Returns [B, Cout, H, W]."""
    assert num_conv_layers in (1, 2)
    B, Cin, H, W = x_nchw.shape
    K = kernel_size
    HW = H * W
    KK = K * K
    Cout = params["pw_w"].shape[0]

    # 2-step "parallel" grid feeds both v7x TensorCores; on v5e/v6e the extra step is
    # one cheap serial iteration.  Each step handles B // G images folded into lanes.
    G = 2 if (B >= 2 and B % 2 == 0) else 1
    Bt = B // G
    N = Bt * HW

    # NCHW -> lane-dense [Cin, B*HW] (batch folded into the lane axis). Tiny, done once.
    x2 = jnp.transpose(x_nchw.reshape(B, Cin, HW), (1, 0, 2)).reshape(Cin, B * HW)
    x2 = x2.astype(jnp.float32)

    # Within-image row / column indices used by the border masks (no in-kernel div/mod).
    j = jnp.arange(HW, dtype=jnp.int32)
    col_ids = jnp.tile(j % W, B)[None, :]
    row_ids = jnp.tile(j // W, B)[None, :]

    # Tiny weight re-layouts, done once outside the kernel.
    dw_w2 = params["dw_w"].reshape(Cin, KK).astype(jnp.float32)             # [Cin, KK]
    dw_b2 = params["dw_b"].reshape(Cin, 1).astype(jnp.float32)
    pw_w2 = params["pw_w"][:, :, 0, 0].astype(jnp.float32)                  # [Cout, Cin]
    pw_b2 = params["pw_b"].reshape(Cout, 1).astype(jnp.float32)

    inputs = [col_ids, row_ids, x2]
    in_specs = [pl.BlockSpec((1, N), lambda g: (0, g)),
                pl.BlockSpec((1, N), lambda g: (0, g)),
                pl.BlockSpec((Cin, N), lambda g: (0, g))]
    if num_conv_layers == 2:
        # c1_w2[o, t*Cin + ci] = c1_w[o, ci, kh, kw],  t = kh*K + kw
        c1_w2 = jnp.transpose(params["c1_w"], (0, 2, 3, 1)).reshape(Cin, KK * Cin)
        inputs += [c1_w2.astype(jnp.float32),
                   params["c1_b"].reshape(Cin, 1).astype(jnp.float32)]
        in_specs += [pl.BlockSpec((Cin, KK * Cin), lambda g: (0, 0)),
                     pl.BlockSpec((Cin, 1), lambda g: (0, 0))]
    inputs += [dw_w2, dw_b2, pw_w2, pw_b2]
    in_specs += [pl.BlockSpec((Cin, KK), lambda g: (0, 0)),
                 pl.BlockSpec((Cin, 1), lambda g: (0, 0)),
                 pl.BlockSpec((Cout, Cin), lambda g: (0, 0)),
                 pl.BlockSpec((Cout, 1), lambda g: (0, 0))]

    flops_per_px = 2 * Cin * KK + 2 * Cout * Cin
    if num_conv_layers == 2:
        flops_per_px += 2 * Cin * Cin * KK
    bytes_accessed = 4 * (Cout * B * HW + sum(int(a.size) for a in inputs))

    out = pl.pallas_call(
        _make_kernel(H, W, K, Cin, Cout, N, num_conv_layers),
        out_shape=jax.ShapeDtypeStruct((Cout, B * HW), jnp.float32),
        grid_spec=pltpu.PrefetchScalarGridSpec(
            num_scalar_prefetch=0,
            grid=(G,),
            in_specs=in_specs,
            out_specs=pl.BlockSpec((Cout, N), lambda g: (0, g))),
        compiler_params=pltpu.CompilerParams(dimension_semantics=("parallel",)),
        cost_estimate=pl.CostEstimate(flops=int(B * HW * flops_per_px),
                                      transcendentals=0,
                                      bytes_accessed=int(bytes_accessed)),
    )(*inputs)

    # lane-dense [Cout, B*HW] -> NCHW (tiny relayout fused by XLA).
    return jnp.transpose(out.reshape(Cout, B, HW), (1, 0, 2)).reshape(B, Cout, H, W)


# ---------------- pure-JAX reference (matches PyTorch semantics) ----------------
def _conv2d(x, w, b, padding, groups=1):
    out = lax.conv_general_dilated(
        x, w, window_strides=(1, 1),
        padding=((padding, padding), (padding, padding)),
        dimension_numbers=("NCHW", "OIHW", "NCHW"),
        feature_group_count=groups,
        precision=lax.Precision.HIGHEST)
    return out + b[None, :, None, None]


def res_conv_block_ref(x, params, kernel_size=5, num_conv_layers=1):
    Cin = x.shape[1]
    p = kernel_size // 2
    out = x
    if num_conv_layers == 2:
        out = _conv2d(jax.nn.relu(out), params["c1_w"], params["c1_b"], p)
    out = _conv2d(jax.nn.relu(out), params["dw_w"], params["dw_b"], p, groups=Cin)
    out = out + x
    out = _conv2d(out, params["pw_w"], params["pw_b"], 0)
    return out


def make_params(key, in_channels, out_channels, kernel_size):
    ks = jax.random.split(key, 6)
    K = kernel_size
    scale = 0.1
    return {
        # PyTorch Conv2d weight layouts
        "c1_w": scale * jax.random.normal(ks[0], (in_channels, in_channels, K, K), jnp.float32),
        "c1_b": scale * jax.random.normal(ks[1], (in_channels,), jnp.float32),
        "dw_w": scale * jax.random.normal(ks[2], (in_channels, 1, K, K), jnp.float32),
        "dw_b": scale * jax.random.normal(ks[3], (in_channels,), jnp.float32),
        "pw_w": scale * jax.random.normal(ks[4], (out_channels, in_channels, 1, 1), jnp.float32),
        "pw_b": scale * jax.random.normal(ks[5], (out_channels,), jnp.float32),
    }


if __name__ == "__main__":
    key = jax.random.PRNGKey(0)
    k_x, k_p = jax.random.split(key)

    B, Cin, Cout, H, W, K = 2, 4, 6, 16, 16, 5
    x = jax.random.normal(k_x, (B, Cin, H, W), jnp.float32)
    params = make_params(k_p, Cin, Cout, K)

    for ncl in (1, 2):
        out = res_conv_block(x, params, kernel_size=K, num_conv_layers=ncl)
        out = jax.block_until_ready(out)
        ref = res_conv_block_ref(x, params, kernel_size=K, num_conv_layers=ncl)
        assert out.shape == (B, Cout, H, W)
        err = float(jnp.max(jnp.abs(out - ref)))
        assert err < 1e-4, f"mismatch for num_conv_layers={ncl}: max err {err}"

    print("KERNEL_OK")
</pallas_src>

<mosaic_0001>
module attributes {stable_mosaic.version = 11 : i64} {
  func.func @kernel(%arg0: i32, %arg1: memref<1x256xi32, #tpu.memory_space<vmem>>, %arg2: memref<1x256xi32, #tpu.memory_space<vmem>>, %arg3: memref<4x256xf32, #tpu.memory_space<vmem>>, %arg4: memref<4x25xf32, #tpu.memory_space<vmem>>, %arg5: memref<4x1xf32, #tpu.memory_space<vmem>>, %arg6: memref<6x4xf32, #tpu.memory_space<vmem>>, %arg7: memref<6x1xf32, #tpu.memory_space<vmem>>, %arg8: memref<6x256xf32, #tpu.memory_space<vmem>>) attributes {dimension_semantics = [#tpu.dimension_semantics<parallel>], iteration_bounds = array<i64: 2>, scalar_prefetch = 0 : i64, scratch_operands = 0 : i64, tpu.core_type = #tpu.core_type<tc>, window_params = [{transform_indices = @transform_0, window_bounds = array<i64: 1, 256>}, {transform_indices = @transform_1, window_bounds = array<i64: 1, 256>}, {transform_indices = @transform_2, window_bounds = array<i64: 4, 256>}, {pipeline_mode = #tpu.pipeline_mode<synchronous>, transform_indices = @transform_3, window_bounds = array<i64: 4, 25>}, {pipeline_mode = #tpu.pipeline_mode<synchronous>, transform_indices = @transform_4, window_bounds = array<i64: 4, 1>}, {pipeline_mode = #tpu.pipeline_mode<synchronous>, transform_indices = @transform_5, window_bounds = array<i64: 6, 4>}, {pipeline_mode = #tpu.pipeline_mode<synchronous>, transform_indices = @transform_6, window_bounds = array<i64: 6, 1>}, {transform_indices = @transform_7, window_bounds = array<i64: 6, 256>}]} {
    %c0 = arith.constant 0 : index
    %c0_0 = arith.constant 0 : index
    %0 = vector.load %arg1[%c0, %c0_0] : memref<1x256xi32, #tpu.memory_space<vmem>>, vector<1x256xi32>
    %c0_1 = arith.constant 0 : index
    %c0_2 = arith.constant 0 : index
    %1 = vector.load %arg2[%c0_1, %c0_2] : memref<1x256xi32, #tpu.memory_space<vmem>>, vector<1x256xi32>
    %c0_3 = arith.constant 0 : index
    %c0_4 = arith.constant 0 : index
    %2 = vector.load %arg3[%c0_3, %c0_4] : memref<4x256xf32, #tpu.memory_space<vmem>>, vector<4x256xf32>
    %c2_i32 = arith.constant 2 : i32
    %3 = vector.broadcast %c2_i32 : i32 to vector<1x256xi32>
    %4 = arith.cmpi sge, %0, %3 : vector<1x256xi32>
    %5 = arith.extui %4 : vector<1x256xi1> to vector<1x256xi32>
    %6 = arith.sitofp %5 : vector<1x256xi32> to vector<1x256xf32>
    %c1_i32 = arith.constant 1 : i32
    %7 = vector.broadcast %c1_i32 : i32 to vector<1x256xi32>
    %8 = arith.cmpi sge, %0, %7 : vector<1x256xi32>
    %9 = arith.extui %8 : vector<1x256xi1> to vector<1x256xi32>
    %10 = arith.sitofp %9 : vector<1x256xi32> to vector<1x256xf32>
    %c15_i32 = arith.constant 15 : i32
    %11 = vector.broadcast %c15_i32 : i32 to vector<1x256xi32>
    %12 = arith.cmpi slt, %0, %11 : vector<1x256xi32>
    %13 = arith.extui %12 : vector<1x256xi1> to vector<1x256xi32>
    %14 = arith.sitofp %13 : vector<1x256xi32> to vector<1x256xf32>
    %c14_i32 = arith.constant 14 : i32
    %15 = vector.broadcast %c14_i32 : i32 to vector<1x256xi32>
    %16 = arith.cmpi slt, %0, %15 : vector<1x256xi32>
    %17 = arith.extui %16 : vector<1x256xi1> to vector<1x256xi32>
    %18 = arith.sitofp %17 : vector<1x256xi32> to vector<1x256xf32>
    %c2_i32_5 = arith.constant 2 : i32
    %19 = vector.broadcast %c2_i32_5 : i32 to vector<1x256xi32>
    %20 = arith.cmpi sge, %1, %19 : vector<1x256xi32>
    %21 = arith.extui %20 : vector<1x256xi1> to vector<1x256xi32>
    %22 = arith.sitofp %21 : vector<1x256xi32> to vector<1x256xf32>
    %c1_i32_6 = arith.constant 1 : i32
    %23 = vector.broadcast %c1_i32_6 : i32 to vector<1x256xi32>
    %24 = arith.cmpi sge, %1, %23 : vector<1x256xi32>
    %25 = arith.extui %24 : vector<1x256xi1> to vector<1x256xi32>
    %26 = arith.sitofp %25 : vector<1x256xi32> to vector<1x256xf32>
    %c15_i32_7 = arith.constant 15 : i32
    %27 = vector.broadcast %c15_i32_7 : i32 to vector<1x256xi32>
    %28 = arith.cmpi slt, %1, %27 : vector<1x256xi32>
    %29 = arith.extui %28 : vector<1x256xi1> to vector<1x256xi32>
    %30 = arith.sitofp %29 : vector<1x256xi32> to vector<1x256xf32>
    %c14_i32_8 = arith.constant 14 : i32
    %31 = vector.broadcast %c14_i32_8 : i32 to vector<1x256xi32>
    %32 = arith.cmpi slt, %1, %31 : vector<1x256xi32>
    %33 = arith.extui %32 : vector<1x256xi1> to vector<1x256xi32>
    %34 = arith.sitofp %33 : vector<1x256xi32> to vector<1x256xf32>
    %cst = arith.constant 0.000000e+00 : f32
    %35 = vector.broadcast %cst : f32 to vector<4x256xf32>
    %36 = arith.maximumf %2, %35 : vector<4x256xf32>
    %c0_9 = arith.constant 0 : index
    %c0_10 = arith.constant 0 : index
    %37 = vector.load %arg4[%c0_9, %c0_10] : memref<4x25xf32, #tpu.memory_space<vmem>>, vector<4x25xf32>
    %c32_i32 = arith.constant 32 : i32
    %38 = tpu.dynamic_rotate %36 by %c32_i32 dim 1 : vector<4x256xf32>, i32 -> vector<4x256xf32>
    %39 = vector.broadcast %22 : vector<1x256xf32> to vector<4x256xf32>
    %40 = arith.mulf %38, %39 : vector<4x256xf32>
    %c2_i32_11 = arith.constant 2 : i32
    %41 = tpu.dynamic_rotate %40 by %c2_i32_11 dim 1 : vector<4x256xf32>, i32 -> vector<4x256xf32>
    %42 = vector.broadcast %6 : vector<1x256xf32> to vector<4x256xf32>
    %43 = arith.mulf %41, %42 : vector<4x256xf32>
    %44 = vector.extract_strided_slice %37 {offsets = [0, 0], sizes = [4, 1], strides = [1, 1]} : vector<4x25xf32> to vector<4x1xf32>
    %45 = vector.broadcast %44 : vector<4x1xf32> to vector<4x256xf32>
    %46 = arith.mulf %45, %43 : vector<4x256xf32>
    %c1_i32_12 = arith.constant 1 : i32
    %47 = tpu.dynamic_rotate %40 by %c1_i32_12 dim 1 : vector<4x256xf32>, i32 -> vector<4x256xf32>
    %48 = vector.broadcast %10 : vector<1x256xf32> to vector<4x256xf32>
    %49 = arith.mulf %47, %48 : vector<4x256xf32>
    %50 = vector.extract_strided_slice %37 {offsets = [0, 1], sizes = [4, 1], strides = [1, 1]} : vector<4x25xf32> to vector<4x1xf32>
    %51 = vector.broadcast %50 : vector<4x1xf32> to vector<4x256xf32>
    %52 = arith.mulf %51, %49 : vector<4x256xf32>
    %53 = arith.addf %46, %52 : vector<4x256xf32>
    %54 = vector.extract_strided_slice %37 {offsets = [0, 2], sizes = [4, 1], strides = [1, 1]} : vector<4x25xf32> to vector<4x1xf32>
    %55 = vector.broadcast %54 : vector<4x1xf32> to vector<4x256xf32>
    %56 = arith.mulf %55, %40 : vector<4x256xf32>
    %57 = arith.addf %53, %56 : vector<4x256xf32>
    %c255_i32 = arith.constant 255 : i32
    %58 = tpu.dynamic_rotate %40 by %c255_i32 dim 1 : vector<4x256xf32>, i32 -> vector<4x256xf32>
    %59 = vector.broadcast %14 : vector<1x256xf32> to vector<4x256xf32>
    %60 = arith.mulf %58, %59 : vector<4x256xf32>
    %61 = vector.extract_strided_slice %37 {offsets = [0, 3], sizes = [4, 1], strides = [1, 1]} : vector<4x25xf32> to vector<4x1xf32>
    %62 = vector.broadcast %61 : vector<4x1xf32> to vector<4x256xf32>
    %63 = arith.mulf %62, %60 : vector<4x256xf32>
    %64 = arith.addf %57, %63 : vector<4x256xf32>
    %c254_i32 = arith.constant 254 : i32
    %65 = tpu.dynamic_rotate %40 by %c254_i32 dim 1 : vector<4x256xf32>, i32 -> vector<4x256xf32>
    %66 = vector.broadcast %18 : vector<1x256xf32> to vector<4x256xf32>
    %67 = arith.mulf %65, %66 : vector<4x256xf32>
    %68 = vector.extract_strided_slice %37 {offsets = [0, 4], sizes = [4, 1], strides = [1, 1]} : vector<4x25xf32> to vector<4x1xf32>
    %69 = vector.broadcast %68 : vector<4x1xf32> to vector<4x256xf32>
    %70 = arith.mulf %69, %67 : vector<4x256xf32>
    %71 = arith.addf %64, %70 : vector<4x256xf32>
    %c16_i32 = arith.constant 16 : i32
    %72 = tpu.dynamic_rotate %36 by %c16_i32 dim 1 : vector<4x256xf32>, i32 -> vector<4x256xf32>
    %73 = vector.broadcast %26 : vector<1x256xf32> to vector<4x256xf32>
    %74 = arith.mulf %72, %73 : vector<4x256xf32>
    %c2_i32_13 = arith.constant 2 : i32
    %75 = tpu.dynamic_rotate %74 by %c2_i32_13 dim 1 : vector<4x256xf32>, i32 -> vector<4x256xf32>
    %76 = vector.broadcast %6 : vector<1x256xf32> to vector<4x256xf32>
    %77 = arith.mulf %75, %76 : vector<4x256xf32>
    %78 = vector.extract_strided_slice %37 {offsets = [0, 5], sizes = [4, 1], strides = [1, 1]} : vector<4x25xf32> to vector<4x1xf32>
    %79 = vector.broadcast %78 : vector<4x1xf32> to vector<4x256xf32>
    %80 = arith.mulf %79, %77 : vector<4x256xf32>
    %81 = arith.addf %71, %80 : vector<4x256xf32>
    %c1_i32_14 = arith.constant 1 : i32
    %82 = tpu.dynamic_rotate %74 by %c1_i32_14 dim 1 : vector<4x256xf32>, i32 -> vector<4x256xf32>
    %83 = vector.broadcast %10 : vector<1x256xf32> to vector<4x256xf32>
    %84 = arith.mulf %82, %83 : vector<4x256xf32>
    %85 = vector.extract_strided_slice %37 {offsets = [0, 6], sizes = [4, 1], strides = [1, 1]} : vector<4x25xf32> to vector<4x1xf32>
    %86 = vector.broadcast %85 : vector<4x1xf32> to vector<4x256xf32>
    %87 = arith.mulf %86, %84 : vector<4x256xf32>
    %88 = arith.addf %81, %87 : vector<4x256xf32>
    %89 = vector.extract_strided_slice %37 {offsets = [0, 7], sizes = [4, 1], strides = [1, 1]} : vector<4x25xf32> to vector<4x1xf32>
    %90 = vector.broadcast %89 : vector<4x1xf32> to vector<4x256xf32>
    %91 = arith.mulf %90, %74 : vector<4x256xf32>
    %92 = arith.addf %88, %91 : vector<4x256xf32>
    %c255_i32_15 = arith.constant 255 : i32
    %93 = tpu.dynamic_rotate %74 by %c255_i32_15 dim 1 : vector<4x256xf32>, i32 -> vector<4x256xf32>
    %94 = vector.broadcast %14 : vector<1x256xf32> to vector<4x256xf32>
    %95 = arith.mulf %93, %94 : vector<4x256xf32>
    %96 = vector.extract_strided_slice %37 {offsets = [0, 8], sizes = [4, 1], strides = [1, 1]} : vector<4x25xf32> to vector<4x1xf32>
    %97 = vector.broadcast %96 : vector<4x1xf32> to vector<4x256xf32>
    %98 = arith.mulf %97, %95 : vector<4x256xf32>
    %99 = arith.addf %92, %98 : vector<4x256xf32>
    %c254_i32_16 = arith.constant 254 : i32
    %100 = tpu.dynamic_rotate %74 by %c254_i32_16 dim 1 : vector<4x256xf32>, i32 -> vector<4x256xf32>
    %101 = vector.broadcast %18 : vector<1x256xf32> to vector<4x256xf32>
    %102 = arith.mulf %100, %101 : vector<4x256xf32>
    %103 = vector.extract_strided_slice %37 {offsets = [0, 9], sizes = [4, 1], strides = [1, 1]} : vector<4x25xf32> to vector<4x1xf32>
    %104 = vector.broadcast %103 : vector<4x1xf32> to vector<4x256xf32>
    %105 = arith.mulf %104, %102 : vector<4x256xf32>
    %106 = arith.addf %99, %105 : vector<4x256xf32>
    %c2_i32_17 = arith.constant 2 : i32
    %107 = tpu.dynamic_rotate %36 by %c2_i32_17 dim 1 : vector<4x256xf32>, i32 -> vector<4x256xf32>
    %108 = vector.broadcast %6 : vector<1x256xf32> to vector<4x256xf32>
    %109 = arith.mulf %107, %108 : vector<4x256xf32>
    %110 = vector.extract_strided_slice %37 {offsets = [0, 10], sizes = [4, 1], strides = [1, 1]} : vector<4x25xf32> to vector<4x1xf32>
    %111 = vector.broadcast %110 : vector<4x1xf32> to vector<4x256xf32>
    %112 = arith.mulf %111, %109 : vector<4x256xf32>
    %113 = arith.addf %106, %112 : vector<4x256xf32>
    %c1_i32_18 = arith.constant 1 : i32
    %114 = tpu.dynamic_rotate %36 by %c1_i32_18 dim 1 : vector<4x256xf32>, i32 -> vector<4x256xf32>
    %115 = vector.broadcast %10 : vector<1x256xf32> to vector<4x256xf32>
    %116 = arith.mulf %114, %115 : vector<4x256xf32>
    %117 = vector.extract_strided_slice %37 {offsets = [0, 11], sizes = [4, 1], strides = [1, 1]} : vector<4x25xf32> to vector<4x1xf32>
    %118 = vector.broadcast %117 : vector<4x1xf32> to vector<4x256xf32>
    %119 = arith.mulf %118, %116 : vector<4x256xf32>
    %120 = arith.addf %113, %119 : vector<4x256xf32>
    %121 = vector.extract_strided_slice %37 {offsets = [0, 12], sizes = [4, 1], strides = [1, 1]} : vector<4x25xf32> to vector<4x1xf32>
    %122 = vector.broadcast %121 : vector<4x1xf32> to vector<4x256xf32>
    %123 = arith.mulf %122, %36 : vector<4x256xf32>
    %124 = arith.addf %120, %123 : vector<4x256xf32>
    %c255_i32_19 = arith.constant 255 : i32
    %125 = tpu.dynamic_rotate %36 by %c255_i32_19 dim 1 : vector<4x256xf32>, i32 -> vector<4x256xf32>
    %126 = vector.broadcast %14 : vector<1x256xf32> to vector<4x256xf32>
    %127 = arith.mulf %125, %126 : vector<4x256xf32>
    %128 = vector.extract_strided_slice %37 {offsets = [0, 13], sizes = [4, 1], strides = [1, 1]} : vector<4x25xf32> to vector<4x1xf32>
    %129 = vector.broadcast %128 : vector<4x1xf32> to vector<4x256xf32>
    %130 = arith.mulf %129, %127 : vector<4x256xf32>
    %131 = arith.addf %124, %130 : vector<4x256xf32>
    %c254_i32_20 = arith.constant 254 : i32
    %132 = tpu.dynamic_rotate %36 by %c254_i32_20 dim 1 : vector<4x256xf32>, i32 -> vector<4x256xf32>
    %133 = vector.broadcast %18 : vector<1x256xf32> to vector<4x256xf32>
    %134 = arith.mulf %132, %133 : vector<4x256xf32>
    %135 = vector.extract_strided_slice %37 {offsets = [0, 14], sizes = [4, 1], strides = [1, 1]} : vector<4x25xf32> to vector<4x1xf32>
    %136 = vector.broadcast %135 : vector<4x1xf32> to vector<4x256xf32>
    %137 = arith.mulf %136, %134 : vector<4x256xf32>
    %138 = arith.addf %131, %137 : vector<4x256xf32>
    %c240_i32 = arith.constant 240 : i32
    %139 = tpu.dynamic_rotate %36 by %c240_i32 dim 1 : vector<4x256xf32>, i32 -> vector<4x256xf32>
    %140 = vector.broadcast %30 : vector<1x256xf32> to vector<4x256xf32>
    %141 = arith.mulf %139, %140 : vector<4x256xf32>
    %c2_i32_21 = arith.constant 2 : i32
    %142 = tpu.dynamic_rotate %141 by %c2_i32_21 dim 1 : vector<4x256xf32>, i32 -> vector<4x256xf32>
    %143 = vector.broadcast %6 : vector<1x256xf32> to vector<4x256xf32>
    %144 = arith.mulf %142, %143 : vector<4x256xf32>
    %145 = vector.extract_strided_slice %37 {offsets = [0, 15], sizes = [4, 1], strides = [1, 1]} : vector<4x25xf32> to vector<4x1xf32>
    %146 = vector.broadcast %145 : vector<4x1xf32> to vector<4x256xf32>
    %147 = arith.mulf %146, %144 : vector<4x256xf32>
    %148 = arith.addf %138, %147 : vector<4x256xf32>
    %c1_i32_22 = arith.constant 1 : i32
    %149 = tpu.dynamic_rotate %141 by %c1_i32_22 dim 1 : vector<4x256xf32>, i32 -> vector<4x256xf32>
    %150 = vector.broadcast %10 : vector<1x256xf32> to vector<4x256xf32>
    %151 = arith.mulf %149, %150 : vector<4x256xf32>
    %152 = vector.extract_strided_slice %37 {offsets = [0, 16], sizes = [4, 1], strides = [1, 1]} : vector<4x25xf32> to vector<4x1xf32>
    %153 = vector.broadcast %152 : vector<4x1xf32> to vector<4x256xf32>
    %154 = arith.mulf %153, %151 : vector<4x256xf32>
    %155 = arith.addf %148, %154 : vector<4x256xf32>
    %156 = vector.extract_strided_slice %37 {offsets = [0, 17], sizes = [4, 1], strides = [1, 1]} : vector<4x25xf32> to vector<4x1xf32>
    %157 = vector.broadcast %156 : vector<4x1xf32> to vector<4x256xf32>
    %158 = arith.mulf %157, %141 : vector<4x256xf32>
    %159 = arith.addf %155, %158 : vector<4x256xf32>
    %c255_i32_23 = arith.constant 255 : i32
    %160 = tpu.dynamic_rotate %141 by %c255_i32_23 dim 1 : vector<4x256xf32>, i32 -> vector<4x256xf32>
    %161 = vector.broadcast %14 : vector<1x256xf32> to vector<4x256xf32>
    %162 = arith.mulf %160, %161 : vector<4x256xf32>
    %163 = vector.extract_strided_slice %37 {offsets = [0, 18], sizes = [4, 1], strides = [1, 1]} : vector<4x25xf32> to vector<4x1xf32>
    %164 = vector.broadcast %163 : vector<4x1xf32> to vector<4x256xf32>
    %165 = arith.mulf %164, %162 : vector<4x256xf32>
    %166 = arith.addf %159, %165 : vector<4x256xf32>
    %c254_i32_24 = arith.constant 254 : i32
    %167 = tpu.dynamic_rotate %141 by %c254_i32_24 dim 1 : vector<4x256xf32>, i32 -> vector<4x256xf32>
    %168 = vector.broadcast %18 : vector<1x256xf32> to vector<4x256xf32>
    %169 = arith.mulf %167, %168 : vector<4x256xf32>
    %170 = vector.extract_strided_slice %37 {offsets = [0, 19], sizes = [4, 1], strides = [1, 1]} : vector<4x25xf32> to vector<4x1xf32>
    %171 = vector.broadcast %170 : vector<4x1xf32> to vector<4x256xf32>
    %172 = arith.mulf %171, %169 : vector<4x256xf32>
    %173 = arith.addf %166, %172 : vector<4x256xf32>
    %c224_i32 = arith.constant 224 : i32
    %174 = tpu.dynamic_rotate %36 by %c224_i32 dim 1 : vector<4x256xf32>, i32 -> vector<4x256xf32>
    %175 = vector.broadcast %34 : vector<1x256xf32> to vector<4x256xf32>
    %176 = arith.mulf %174, %175 : vector<4x256xf32>
    %c2_i32_25 = arith.constant 2 : i32
    %177 = tpu.dynamic_rotate %176 by %c2_i32_25 dim 1 : vector<4x256xf32>, i32 -> vector<4x256xf32>
    %178 = vector.broadcast %6 : vector<1x256xf32> to vector<4x256xf32>
    %179 = arith.mulf %177, %178 : vector<4x256xf32>
    %180 = vector.extract_strided_slice %37 {offsets = [0, 20], sizes = [4, 1], strides = [1, 1]} : vector<4x25xf32> to vector<4x1xf32>
    %181 = vector.broadcast %180 : vector<4x1xf32> to vector<4x256xf32>
    %182 = arith.mulf %181, %179 : vector<4x256xf32>
    %183 = arith.addf %173, %182 : vector<4x256xf32>
    %c1_i32_26 = arith.constant 1 : i32
    %184 = tpu.dynamic_rotate %176 by %c1_i32_26 dim 1 : vector<4x256xf32>, i32 -> vector<4x256xf32>
    %185 = vector.broadcast %10 : vector<1x256xf32> to vector<4x256xf32>
    %186 = arith.mulf %184, %185 : vector<4x256xf32>
    %187 = vector.extract_strided_slice %37 {offsets = [0, 21], sizes = [4, 1], strides = [1, 1]} : vector<4x25xf32> to vector<4x1xf32>
    %188 = vector.broadcast %187 : vector<4x1xf32> to vector<4x256xf32>
    %189 = arith.mulf %188, %186 : vector<4x256xf32>
    %190 = arith.addf %183, %189 : vector<4x256xf32>
    %191 = vector.extract_strided_slice %37 {offsets = [0, 22], sizes = [4, 1], strides = [1, 1]} : vector<4x25xf32> to vector<4x1xf32>
    %192 = vector.broadcast %191 : vector<4x1xf32> to vector<4x256xf32>
    %193 = arith.mulf %192, %176 : vector<4x256xf32>
    %194 = arith.addf %190, %193 : vector<4x256xf32>
    %c255_i32_27 = arith.constant 255 : i32
    %195 = tpu.dynamic_rotate %176 by %c255_i32_27 dim 1 : vector<4x256xf32>, i32 -> vector<4x256xf32>
    %196 = vector.broadcast %14 : vector<1x256xf32> to vector<4x256xf32>
    %197 = arith.mulf %195, %196 : vector<4x256xf32>
    %198 = vector.extract_strided_slice %37 {offsets = [0, 23], sizes = [4, 1], strides = [1, 1]} : vector<4x25xf32> to vector<4x1xf32>
    %199 = vector.broadcast %198 : vector<4x1xf32> to vector<4x256xf32>
    %200 = arith.mulf %199, %197 : vector<4x256xf32>
    %201 = arith.addf %194, %200 : vector<4x256xf32>
    %c254_i32_28 = arith.constant 254 : i32
    %202 = tpu.dynamic_rotate %176 by %c254_i32_28 dim 1 : vector<4x256xf32>, i32 -> vector<4x256xf32>
    %203 = vector.broadcast %18 : vector<1x256xf32> to vector<4x256xf32>
    %204 = arith.mulf %202, %203 : vector<4x256xf32>
    %205 = vector.extract_strided_slice %37 {offsets = [0, 24], sizes = [4, 1], strides = [1, 1]} : vector<4x25xf32> to vector<4x1xf32>
    %206 = vector.broadcast %205 : vector<4x1xf32> to vector<4x256xf32>
    %207 = arith.mulf %206, %204 : vector<4x256xf32>
    %208 = arith.addf %201, %207 : vector<4x256xf32>
    %c0_29 = arith.constant 0 : index
    %c0_30 = arith.constant 0 : index
    %209 = vector.load %arg5[%c0_29, %c0_30] : memref<4x1xf32, #tpu.memory_space<vmem>>, vector<4x1xf32>
    %210 = vector.broadcast %209 : vector<4x1xf32> to vector<4x256xf32>
    %211 = arith.addf %208, %210 : vector<4x256xf32>
    %212 = arith.addf %211, %2 : vector<4x256xf32>
    %c0_31 = arith.constant 0 : index
    %c0_32 = arith.constant 0 : index
    %213 = vector.load %arg6[%c0_31, %c0_32] : memref<6x4xf32, #tpu.memory_space<vmem>>, vector<6x4xf32>
    %214 = vector.extract_strided_slice %213 {offsets = [0, 0], sizes = [6, 1], strides = [1, 1]} : vector<6x4xf32> to vector<6x1xf32>
    %215 = vector.extract_strided_slice %212 {offsets = [0, 0], sizes = [1, 256], strides = [1, 1]} : vector<4x256xf32> to vector<1x256xf32>
    %216 = vector.broadcast %214 : vector<6x1xf32> to vector<6x256xf32>
    %217 = vector.broadcast %215 : vector<1x256xf32> to vector<6x256xf32>
    %218 = arith.mulf %216, %217 : vector<6x256xf32>
    %219 = vector.extract_strided_slice %213 {offsets = [0, 1], sizes = [6, 1], strides = [1, 1]} : vector<6x4xf32> to vector<6x1xf32>
    %220 = vector.extract_strided_slice %212 {offsets = [1, 0], sizes = [1, 256], strides = [1, 1]} : vector<4x256xf32> to vector<1x256xf32>
    %221 = vector.broadcast %219 : vector<6x1xf32> to vector<6x256xf32>
    %222 = vector.broadcast %220 : vector<1x256xf32> to vector<6x256xf32>
    %223 = arith.mulf %221, %222 : vector<6x256xf32>
    %224 = arith.addf %218, %223 : vector<6x256xf32>
    %225 = vector.extract_strided_slice %213 {offsets = [0, 2], sizes = [6, 1], strides = [1, 1]} : vector<6x4xf32> to vector<6x1xf32>
    %226 = vector.extract_strided_slice %212 {offsets = [2, 0], sizes = [1, 256], strides = [1, 1]} : vector<4x256xf32> to vector<1x256xf32>
    %227 = vector.broadcast %225 : vector<6x1xf32> to vector<6x256xf32>
    %228 = vector.broadcast %226 : vector<1x256xf32> to vector<6x256xf32>
    %229 = arith.mulf %227, %228 : vector<6x256xf32>
    %230 = arith.addf %224, %229 : vector<6x256xf32>
    %231 = vector.extract_strided_slice %213 {offsets = [0, 3], sizes = [6, 1], strides = [1, 1]} : vector<6x4xf32> to vector<6x1xf32>
    %232 = vector.extract_strided_slice %212 {offsets = [3, 0], sizes = [1, 256], strides = [1, 1]} : vector<4x256xf32> to vector<1x256xf32>
    %233 = vector.broadcast %231 : vector<6x1xf32> to vector<6x256xf32>
    %234 = vector.broadcast %232 : vector<1x256xf32> to vector<6x256xf32>
    %235 = arith.mulf %233, %234 : vector<6x256xf32>
    %236 = arith.addf %230, %235 : vector<6x256xf32>
    %c0_33 = arith.constant 0 : index
    %c0_34 = arith.constant 0 : index
    %237 = vector.load %arg7[%c0_33, %c0_34] : memref<6x1xf32, #tpu.memory_space<vmem>>, vector<6x1xf32>
    %238 = vector.broadcast %237 : vector<6x1xf32> to vector<6x256xf32>
    %239 = arith.addf %236, %238 : vector<6x256xf32>
    %c0_35 = arith.constant 0 : index
    %c0_36 = arith.constant 0 : index
    %240 = vector.load %arg8[%c0_35, %c0_36] : memref<6x256xf32, #tpu.memory_space<vmem>>, vector<6x256xf32>
    tpu.vector_store %arg8[%c0_35, %c0_36], %239 {strides = array<i32>} : memref<6x256xf32, #tpu.memory_space<vmem>>, vector<6x256xf32>,
    return
  }
  func.func @transform_0(%arg0: i32) -> (i32, i32) {
    %c0_i32 = arith.constant 0 : i32
    %c0_i32_0 = arith.constant 0 : i32
    return %c0_i32, %arg0 : i32, i32
  }
  func.func @transform_1(%arg0: i32) -> (i32, i32) {
    %c0_i32 = arith.constant 0 : i32
    %c0_i32_0 = arith.constant 0 : i32
    return %c0_i32, %arg0 : i32, i32
  }
  func.func @transform_2(%arg0: i32) -> (i32, i32) {
    %c0_i32 = arith.constant 0 : i32
    %c0_i32_0 = arith.constant 0 : i32
    return %c0_i32, %arg0 : i32, i32
  }
  func.func @transform_3(%arg0: i32) -> (i32, i32) {
    %c0_i32 = arith.constant 0 : i32
    %c0_i32_0 = arith.constant 0 : i32
    %c0_i32_1 = arith.constant 0 : i32
    return %c0_i32, %c0_i32_0 : i32, i32
  }
  func.func @transform_4(%arg0: i32) -> (i32, i32) {
    %c0_i32 = arith.constant 0 : i32
    %c0_i32_0 = arith.constant 0 : i32
    %c0_i32_1 = arith.constant 0 : i32
    return %c0_i32, %c0_i32_0 : i32, i32
  }
  func.func @transform_5(%arg0: i32) -> (i32, i32) {
    %c0_i32 = arith.constant 0 : i32
    %c0_i32_0 = arith.constant 0 : i32
    %c0_i32_1 = arith.constant 0 : i32
    return %c0_i32, %c0_i32_0 : i32, i32
  }
  func.func @transform_6(%arg0: i32) -> (i32, i32) {
    %c0_i32 = arith.constant 0 : i32
    %c0_i32_0 = arith.constant 0 : i32
    %c0_i32_1 = arith.constant 0 : i32
    return %c0_i32, %c0_i32_0 : i32, i32
  }
  func.func @transform_7(%arg0: i32) -> (i32, i32) {
    %c0_i32 = arith.constant 0 : i32
    %c0_i32_0 = arith.constant 0 : i32
    return %c0_i32, %arg0 : i32, i32
  }
}

</mosaic_0001>

<bundles_post_ra>
// kernel: res_conv_block.1
= control target key start
LH: loop header
LB: loop body
LE: loop exit
PB: predicated region body
PF: predicated region fallthrough
CT: control target
= control target key end

     0   :  { %s1151_s24 = smov 0   ;;  %s1589_s0 = inlined_call_operand.vmem [shape: s32[1,512], index: 0, kind: input, shape index: {}]   ;;  %s1590_s1 = inlined_call_operand.vmem [shape: s32[1,512], index: 1, kind: input, shape index: {}]   ;;  %s1591_s2 = inlined_call_operand.vmem [shape: f32[4,512], index: 2, kind: input, shape index: {}]   ;;  %s1592_s3 = inlined_call_operand.vmem [shape: f32[4,25], index: 3, kind: input, shape index: {}]   ;;  %s1593_s4 = inlined_call_operand.vmem [shape: f32[4,1], index: 4, kind: input, shape index: {}]   ;;  %s1594_s5 = inlined_call_operand.vmem [shape: f32[6,4], index: 5, kind: input, shape index: {}]   ;;  %s1595_s6 = inlined_call_operand.vmem [shape: f32[6,1], index: 6, kind: input, shape index: {}]   ;;  %s1596_s7 = inlined_call_operand.vmem [shape: f32[6,512], index: 7, kind: output, shape index: {}]  }
   0x1 LB: > { %s976_s25 = sadd.s32 4294967295, %s1075_s24   ;;  %p980_p0 = scmp.ge.s32.totalorder %s1075_s24, 1  ;;  %s1075_s24 = sphi %s1151_s24, %s17_s24  }
   0x2   : > { %p258_p1 = scmp.lt.s32.totalorder %s1075_s24, 3 }
   0x4   : > { %p259_p2 = pnand %p980_p0, %p258_p1 }
   0x5   : > { %s981_s28 = sshll.u32 (!%p259_p2), %s976_s25, 1  ;;  %s1081_s10 = smov (!%p259_p2), 32  }
   0x6   : > { %262 = sbr.rel (%p259_p2) target bundleno = 388 (0x184), region = 48  ;;  %p299_p3 = scmp.lt.s32.totalorder (!%p259_p2), %s981_s28, 3 }
   0x7   : > { %s1085_s11 = smov (!%p259_p2), 16   ;;  %s1088_s12 = smov (!%p259_p2), 2  }
   0x8   : > { %s1091_s13 = smov (!%p259_p2), 1   ;;  %s1093_s14 = smov (!%p259_p2), 127  }
   0x9   : > { %s1095_s15 = smov (!%p259_p2), 126   ;;  %s1098_s16 = smov (!%p259_p2), 112  }
   0xa   : > { %s1102_s17 = smov (!%p259_p2), 96  }
   0xb   : > { %v1162_v0 = vld [vmem:[%s1592_s3] sm:$0xf]  ;;  %v1077_v1 = vmov 0   ;;  %v1078_v2 = vmov 1   ;;  %s1598_s28 = smov (!%p299_p3, %s981_s28), 3  ;;  %v1079_v5 = vmov 2   ;;  %v359_v50 = vlaneseq }
   0xc   : > { %1039 = vset.pattern.permute.xlu2 %v1077_v1  ;;  %1040 = vset.pattern.permute.xlu1 %v1078_v2  ;;  %s984_s29 = sshll.u32 %s1598_s28, 2  ;;  %v1080_v6 = vmov 5   ;;  %v1082_v9 = vmov 3   ;;  %v1083_v10 = vmov 6   ;;  %v1084_v11 = vmov 12   ;;  %s306_s20 = scalar_lea.vmem %s1590_s1, %s1598_s28 }
   0xd   : > { %387 = vperm.xlu2 %1039, %v1162_v0   ;;  %407 = vperm.xlu1 %1040, %v1162_v0   ;;  %s312_s9 = scalar_lea.vmem %s1591_s2, %s984_s29  ;;  %v1086_v14 = vmov 4   ;;  %v1087_v17 = vmov 7   ;;  %v1089_v20 = vmov 13   ;;  %v1090_v21 = vmov 8   ;;  %v1235_v48 = vld [vmem:[%s306_s20] sm:$0x3]  ;;  %s301_s23 = scalar_lea.vmem %s1589_s0, %s1598_s28 }
   0xe   : > { %v1174_v3 = vld [vmem:[%s312_s9] sm:$0xff]  ;;  %1051 = vset.pattern.permute.xlu0 %v1084_v11  ;;  %v1092_v24 = vmov 9   ;;  %v1094_v27 = vmov 10   ;;  %v1096_v30 = vmov 15   ;;  %v1097_v31 = vmov 11   ;;  %s986_s9 = sshll.u32 %s1598_s28, 3 }
   0xf   : > { %v1177_v4 = vmax.f32 %v1174_v3, 0.0  ;;  %v1099_v34 = vmov 14   ;;  %v1100_v37 = vmov 17   ;;  %v1101_v38 = vmov 16  }
  0x10   : > { %v1103_v40 = vmov 19   ;;  %v1104_v42 = vmov 20   ;;  %v1105_v44 = vmov 18   ;;  %vm335_vm0 = vcmp.ge.s32.totalorder %v1235_v48, 2 }
  0x11   : > { %350 = vst [vmem:[#allocation1] ss:$2 sm:$0xff] %v1177_v4  ;;  %v1240_v52 = vand.u32 127, %v359_v50  ;;  %v1106_v53 = vmov 0.0   ;;  %v1107_v56 = vmov 22   ;;  %vm338_vm2 = vcmp.ge.s32.totalorder %v1235_v48, 1 }
  0x12   : > { %v991_v54 = vsel %vm335_vm0, 1.0, %v1106_v53  ;;  %vm341_vm12 = vcmp.lt.s32.totalorder %v1235_v48, 15  ;;  %vm344_vm14 = vcmp.lt.s32.totalorder %v1235_v48, 14 }
  0x13   : > { %vm361_vm1 = vcmp.lt.s32.totalorder %v1240_v52, 32  ;;  %v365_v57 = vperm.slane %v991_v54, 0  ;;  %v366_v58 = vperm.slane %v991_v54, 1  ;;  %vm475_vm3 = vcmp.lt.s32.totalorder %v1240_v52, 16 }
  0x14   : > { %vm375_vm5 = vcmp.lt.s32.totalorder %v1240_v52, 2  ;;  %vm396_vm7 = vcmp.lt.s32.totalorder %v1240_v52, 1  ;;  %vm426_vm9 = vcmp.lt.s32.totalorder %v1240_v52, 127  ;;  %vm448_vm11 = vcmp.lt.s32.totalorder %v1240_v52, 126 }
  0x15   : > { %1041 = vset.pattern.permute.xlu2 %v1079_v5  ;;  %1044 = vset.pattern.permute.xlu1 %v1080_v6  ;;  %vm663_vm13 = vcmp.lt.s32.totalorder %v1240_v52, 112  ;;  %vm754_vm15 = vcmp.lt.s32.totalorder %v1240_v52, 96 }
  0x16   : > { %415 = vperm.xlu2 %1041, %v1162_v0   ;;  %494 = vperm.xlu1 %1044, %v1162_v0  }
  0x18   : > { %v351_v7 = vld.sshfl [vmem:[#allocation1] sm:$0xff pattern:$0x75316420]  ;;  %v352_v8 = vld.sshfl [vmem:[#allocation1 + $0x8] sm:$0xff pattern:$0x75316420] }
  0x19   : > { %355 = vrot.lane.b32.xlu0 %v351_v7, %s1081_s10  ;;  %466 = vst [vmem:[#allocation1] ss:$2 sm:$0xff] %v1177_v4 }
  0x1e   : > { %1042 = vset.pattern.permute.xlu2 %v1082_v9  ;;  %1045 = vset.pattern.permute.xlu1 %v1083_v10  ;;  %v1261_v10 = vld [vmem:[%s301_s23] sm:$0x3] }
  0x1f   : > { %437 = vperm.xlu2 %1042, %v1162_v0   ;;  %vm323_vm4 = vcmp.ge.s32.totalorder %v1261_v10, 2  ;;  %vm326_vm6 = vcmp.ge.s32.totalorder %v1261_v10, 1  ;;  %vm329_vm8 = vcmp.lt.s32.totalorder %v1261_v10, 15  ;;  %vm332_vm10 = vcmp.lt.s32.totalorder %v1261_v10, 14 }
  0x20   : > { %v468_v12 = vld.sshfl [vmem:[#allocation1 + $0x8] sm:$0xff pattern:$0x75316420]  ;;  %v467_v13 = vld.sshfl [vmem:[#allocation1] sm:$0xff pattern:$0x75316420] }
  0x21   : > { %357 = vrot.lane.b32.xlu0 %v352_v8, %s1081_s10  ;;  %473 = vrot.lane.b32.xlu1 %v468_v12, %s1085_s11  ;;  %557 = vst [vmem:[#allocation1] ss:$2 sm:$0xff] %v1177_v4 }
  0x27   : > { %1043 = vset.pattern.permute.xlu2 %v1086_v14 }
  0x28   : > { %459 = vperm.xlu2 %1043, %v1162_v0   ;;  %v558_v15 = vld.sshfl [vmem:[#allocation1] sm:$0xff pattern:$0x75316420]  ;;  %v559_v16 = vld.sshfl [vmem:[#allocation1 + $0x8] sm:$0xff pattern:$0x75316420] }
  0x29   : > { %471 = vrot.lane.b32.xlu0 %v467_v13, %s1085_s11  ;;  %510 = vperm.xlu1 %1045, %v1162_v0   ;;  %578 = vst [vmem:[#allocation1] ss:$2 sm:$0xff] %v1177_v4 }
  0x30   : > { %1046 = vset.pattern.permute.xlu2 %v1087_v17  ;;  %v579_v18 = vld.sshfl [vmem:[#allocation1] sm:$0xff pattern:$0x75316420]  ;;  %v580_v19 = vld.sshfl [vmem:[#allocation1 + $0x8] sm:$0xff pattern:$0x75316420] }
  0x31   : > { %518 = vperm.xlu2 %1046, %v1162_v0   ;;  %562 = vrot.lane.b32.xlu0 %v558_v15, %s1088_s12  ;;  %603 = vst [vmem:[#allocation1] ss:$2 sm:$0xff] %v1177_v4 }
  0x32   : > { %564 = vrot.lane.b32.xlu1 %v559_v16, %s1088_s12 }
  0x33   : > { %1052 = vset.pattern.permute.xlu1 %v1089_v20 }
  0x38   : > { %v1195_v22 = vld.sshfl [vmem:[#allocation1] sm:$0xff pattern:$0x75316420]  ;;  %v1197_v23 = vld.sshfl [vmem:[#allocation1 + $0x8] sm:$0xff pattern:$0x75316420] }
  0x39   : > { %1047 = vset.pattern.permute.xlu2 %v1090_v21  ;;  %583 = vrot.lane.b32.xlu0 %v579_v18, %s1091_s13  ;;  %612 = vst [vmem:[#allocation1] ss:$2 sm:$0xff] %v1177_v4 }
  0x3a   : > { %534 = vperm.xlu2 %1047, %v1162_v0   ;;  %585 = vrot.lane.b32.xlu1 %v580_v19, %s1091_s13  ;;  %v987_v19 = vsel %vm323_vm4, 1.0, %v1106_v53 }
  0x40   : > { %v613_v25 = vld.sshfl [vmem:[#allocation1] sm:$0xff pattern:$0x75316420]  ;;  %v614_v26 = vld.sshfl [vmem:[#allocation1 + $0x8] sm:$0xff pattern:$0x75316420] }
  0x41   : > { %600 = vperm.xlu0 %1051, %v1162_v0   ;;  %633 = vst [vmem:[#allocation1] ss:$2 sm:$0xff] %v1177_v4 }
  0x42   : > { %1048 = vset.pattern.permute.xlu2 %v1092_v24  ;;  %617 = vrot.lane.b32.xlu1 %v613_v25, %s1093_s14  ;;  %v1283_v25 = vperm.slane %v987_v19, 0 }
  0x43   : > { %550 = vperm.xlu2 %1048, %v1162_v0  }
  0x48   : > { %v635_v28 = vld.sshfl [vmem:[#allocation1 + $0x8] sm:$0xff pattern:$0x75316420]  ;;  %v634_v29 = vld.sshfl [vmem:[#allocation1] sm:$0xff pattern:$0x75316420] }
  0x49   : > { %640 = vrot.lane.b32.xlu0 %v635_v28, %s1095_s15  ;;  %654 = vst [vmem:[#allocation1] ss:$2 sm:$0xff] %v1177_v4 }
  0x4a   : > { %626 = vperm.xlu1 %1052, %v1162_v0   ;;  %1054 = vset.pattern.permute.xlu0 %v1096_v30 }
  0x4b   : > { %1049 = vset.pattern.permute.xlu2 %v1094_v27 }
  0x4c   : > { %571 = vperm.xlu2 %1049, %v1162_v0  }
  0x50   : > { %v656_v32 = vld.sshfl [vmem:[#allocation1 + $0x8] sm:$0xff pattern:$0x75316420]  ;;  %v655_v33 = vld.sshfl [vmem:[#allocation1] sm:$0xff pattern:$0x75316420] }
  0x51   : > { %661 = vrot.lane.b32.xlu0 %v656_v32, %s1098_s16  ;;  %745 = vst [vmem:[#allocation1] ss:$2 sm:$0xff] %v1177_v4  ;;  %v992_v4 = vsel %vm338_vm2, 1.0, %v1106_v53 }
  0x52   : > { %1053 = vset.pattern.permute.xlu1 %v1099_v34  ;;  %v479_v11 = vperm.slane %v992_v4, 0  ;;  %v480_v12 = vperm.slane %v992_v4, 1  ;;  %v1108_v34 = vmov 21  }
  0x53   : > { %647 = vperm.xlu1 %1053, %v1162_v0  }
  0x54   : > { %1050 = vset.pattern.permute.xlu2 %v1097_v31 }
  0x55   : > { %592 = vperm.xlu2 %1050, %v1162_v0  }
  0x58   : > { %v747_v35 = vld.sshfl [vmem:[#allocation1 + $0x8] sm:$0xff pattern:$0x75316420]  ;;  %v746_v36 = vld.sshfl [vmem:[#allocation1] sm:$0xff pattern:$0x75316420] }
  0x59   : > { %682 = vperm.xlu0 %1054, %v1162_v0   ;;  %845 = vst [vmem:[#allocation1] ss:$2 sm:$0xff] %v1174_v3 }
  0x5b   : > { %1055 = vset.pattern.permute.xlu1 %v1101_v38 }
  0x5c   : > { %698 = vperm.xlu1 %1055, %v1162_v0  }
  0x5d   : > { %619 = vrot.lane.b32.xlu2 %v614_v26, %s1093_s14  ;;  %v1285_v26 = vperm.slane %v987_v19, 1 }
  0x5e   : > { %1056 = vset.pattern.permute.xlu2 %v1100_v37 }
  0x61   : > { %750 = vrot.lane.b32.xlu0 %v746_v36, %s1102_s17 }
  0x62   : > { %1064 = vset.pattern.permute.xlu0 %v1077_v1 }
  0x64   : > { %752 = vrot.lane.b32.xlu1 %v747_v35, %s1102_s17 }
  0x65   : > { %638 = vrot.lane.b32.xlu2 %v634_v29, %s1095_s15  ;;  %1058 = vset.pattern.permute.xlu1 %v1103_v40 }
  0x67   : > { %v1218_v39 = vpop.permute.xlu2 %387 }
  0x6c   : > { %738 = vperm.xlu1 %1058, %v1162_v0  }
  0x6d   : > { %659 = vrot.lane.b32.xlu2 %v655_v33, %s1098_s16  ;;  %v988_v33 = vsel %vm326_vm6, 1.0, %v1106_v53 }
  0x6e   : > { %v1304_v37 = vperm.slane %v988_v33, 0  ;;  %v1306_v38 = vperm.slane %v988_v33, 1 }
  0x70   : > { %v416_v41 = vpop.permute.xlu2 %415 }
  0x74   : > { %1059 = vset.pattern.permute.xlu1 %v1104_v42 }
  0x75   : > { %706 = vperm.xlu2 %1056, %v1162_v0   ;;  %773 = vperm.xlu1 %1059, %v1162_v0  }
  0x79   : > { %v1223_v43 = vpop.permute.xlu2 %437 }
  0x7d   : > { %1057 = vset.pattern.permute.xlu2 %v1105_v44  ;;  %1060 = vset.pattern.permute.xlu1 %v1108_v34 }
  0x7e   : > { %722 = vperm.xlu2 %1057, %v1162_v0  }
  0x7f   : > { %v1229_v46 = vpop.permute.xlu1 %407 }
  0x82   : > { %v1227_v45 = vpop.permute.xlu2 %459 }
  0x86   : > { %1061 = vset.pattern.permute.xlu2 %v1107_v56 }
  0x88   : > { %v1237_v49 = vpop.permute.xlu1 %494 }
  0x8b   : > { %v519_v47 = vpop.permute.xlu2 %518  ;;  %v356_v51 = vpop.permute.xlu0 %355 }
  0x93   : > { %v358_v59 = vpop.permute.xlu0 %357  ;;  %v474_v60 = vpop.permute.xlu1 %473 }
  0x94   : > { %v1243_v55 = vpop.permute.xlu2 %534  ;;  %v362_v61 = vsel %vm361_vm1, %v356_v51, %v358_v59  ;;  %v363_v62 = vsel %vm361_vm1, %v358_v59, %v356_v51 }
  0x95   : > { %v369_v63 = vmul.f32 %v365_v57, %v363_v62  ;;  %v370_v3 = vmul.f32 %v366_v58, %v362_v61  ;;  %v989_v57 = vsel %vm329_vm8, 1.0, %v1106_v53 }
  0x96   : > { %v1327_v61 = vperm.slane %v989_v57, 0  ;;  %v1329_v62 = vperm.slane %v989_v57, 1 }
  0x97   : > { %394 = vrot.lane.b32.xlu0 %v370_v3, %s1091_s13  ;;  %392 = vrot.lane.b32.xlu2 %v369_v63, %s1091_s13  ;;  %v1254_v6 = vmul.f32 %v416_v41, %v370_v3  ;;  %v1256_v7 = vmul.f32 %v416_v41, %v369_v63 }
  0x98   : > { %371 = vrot.lane.b32.xlu1 %v369_v63, %s1088_s12 }
  0x9b   : > { %v472_v13 = vpop.permute.xlu0 %471  ;;  %v1264_v14 = vpop.permute.xlu1 %510 }
  0x9c   : > { %v476_v15 = vsel %vm475_vm3, %v472_v13, %v474_v60  ;;  %v477_v16 = vsel %vm475_vm3, %v474_v60, %v472_v13  ;;  %v990_v13 = vsel %vm332_vm10, 1.0, %v1106_v53 }
  0x9d   : > { %v1259_v8 = vpop.permute.xlu2 %550  ;;  %v1267_v17 = vmul.f32 %v479_v11, %v477_v16  ;;  %v1269_v18 = vmul.f32 %v480_v12, %v476_v15 }
  0x9f   : > { %422 = vrot.lane.b32.xlu0 %v369_v63, %s1093_s14  ;;  %485 = vrot.lane.b32.xlu2 %v1267_v17, %s1088_s12  ;;  %v1276_v20 = vmul.f32 %v519_v47, %v1267_v17  ;;  %v1279_v21 = vmul.f32 %v519_v47, %v1269_v18 }
  0xa0   : > { %373 = vrot.lane.b32.xlu1 %v370_v3, %s1088_s12 }
  0xa3   : > { %v563_v27 = vpop.permute.xlu0 %562 }
  0xa4   : > { %v565_v28 = vpop.permute.xlu1 %564 }
  0xa5   : > { %v566_v29 = vsel %vm375_vm5, %v563_v27, %v565_v28  ;;  %v567_v30 = vsel %vm375_vm5, %v565_v28, %v563_v27  ;;  %v1353_v28 = vperm.slane %v990_v13, 0 }
  0xa6   : > { %v572_v24 = vpop.permute.xlu2 %571  ;;  %v568_v31 = vmul.f32 %v567_v30, %v1283_v25  ;;  %v569_v32 = vmul.f32 %v566_v29, %v1285_v26  ;;  %v1355_v29 = vperm.slane %v990_v13, 1  ;;  %v993_v30 = vsel %vm341_vm12, 1.0, %v1106_v53 }
  0xa7   : > { %444 = vrot.lane.b32.xlu0 %v369_v63, %s1095_s15  ;;  %501 = vrot.lane.b32.xlu2 %v1267_v17, %s1091_s13  ;;  %v668_v33 = vperm.slane %v993_v30, 1 }
  0xa8   : > { %v1295_v35 = vmul.f32 %v572_v24, %v568_v31  ;;  %v1297_v36 = vmul.f32 %v572_v24, %v569_v32  ;;  %424 = vrot.lane.b32.xlu1 %v370_v3, %s1093_s14 }
  0xab   : > { %v584_v41 = vpop.permute.xlu0 %583 }
  0xac   : > { %v586_v42 = vpop.permute.xlu1 %585 }
  0xad   : > { %v587_v44 = vsel %vm396_vm7, %v584_v41, %v586_v42  ;;  %v588_v47 = vsel %vm396_vm7, %v586_v42, %v584_v41  ;;  %v667_v41 = vperm.slane %v993_v30, 0 }
  0xae   : > { %v589_v50 = vmul.f32 %v588_v47, %v1304_v37  ;;  %v590_v51 = vmul.f32 %v587_v44, %v1306_v38 }
  0xaf   : > { %v593_v40 = vpop.permute.xlu2 %592  ;;  %487 = vrot.lane.b32.xlu0 %v1269_v18, %s1088_s12  ;;  %797 = vperm.xlu2 %1061, %v1162_v0  }
  0xb0   : > { %v1315_v54 = vmul.f32 %v593_v40, %v589_v50  ;;  %v1317_v56 = vmul.f32 %v593_v40, %v590_v51  ;;  %446 = vrot.lane.b32.xlu1 %v370_v3, %s1095_s15 }
  0xb3   : > { %v1325_v59 = vpop.permute.xlu0 %600 }
  0xb4   : > { %v618_v60 = vpop.permute.xlu1 %617 }
  0xb7   : > { %v620_v58 = vpop.permute.xlu2 %619  ;;  %503 = vrot.lane.b32.xlu0 %v1269_v18, %s1091_s13 }
  0xb8   : > { %v621_v63 = vsel %vm426_vm9, %v618_v60, %v620_v58  ;;  %v622_v4 = vsel %vm426_vm9, %v620_v58, %v618_v60  ;;  %527 = vrot.lane.b32.xlu1 %v1269_v18, %s1093_s14 }
  0xb9   : > { %v623_v3 = vmul.f32 %v621_v63, %v1327_v61  ;;  %v624_v11 = vmul.f32 %v622_v4, %v1329_v62 }
  0xbb   : > { %v641_v15 = vpop.permute.xlu0 %640 }
  0xbc   : > { %v627_v16 = vpop.permute.xlu1 %626 }
  0xbd   : > { %v1349_v24 = vmul.f32 %v627_v16, %v623_v3  ;;  %v1351_v27 = vmul.f32 %v627_v16, %v624_v11  ;;  %v994_v11 = vsel %vm344_vm14, 1.0, %v1106_v53  ;;  %v1110_v53 = vmov 24  }
  0xbe   : > { %v759_v16 = vperm.slane %v994_v11, 1  ;;  %1063 = vset.pattern.permute.xlu2 %v1110_v53 }
  0xbf   : > { %v639_v12 = vpop.permute.xlu2 %638  ;;  %525 = vrot.lane.b32.xlu0 %v1267_v17, %s1093_s14 }
  0xc0   : > { %v642_v19 = vsel %vm448_vm11, %v639_v12, %v641_v15  ;;  %v643_v10 = vsel %vm448_vm11, %v641_v15, %v639_v12  ;;  %543 = vrot.lane.b32.xlu1 %v1269_v18, %s1095_s15  ;;  %v758_v15 = vperm.slane %v994_v11, 0 }
  0xc1   : > { %v644_v31 = vmul.f32 %v642_v19, %v1353_v28  ;;  %v645_v32 = vmul.f32 %v643_v10, %v1355_v29 }
  0xc3   : > { %v662_v40 = vpop.permute.xlu0 %661 }
  0xc5   : > { %v648_v47 = vpop.permute.xlu1 %647 }
  0xc6   : > { %v1365_v51 = vmul.f32 %v648_v47, %v644_v31  ;;  %v1367_v57 = vmul.f32 %v648_v47, %v645_v32  ;;  %v852_v32 = vld [vmem:[%s1594_s5] sm:$0x3f] }
  0xc7   : > { %v660_v34 = vpop.permute.xlu2 %659  ;;  %541 = vrot.lane.b32.xlu0 %v1267_v17, %s1095_s15  ;;  %v1109_v17 = vmov 23  }
  0xc8   : > { %v664_v42 = vsel %vm663_vm13, %v660_v34, %v662_v40  ;;  %v665_v44 = vsel %vm663_vm13, %v662_v40, %v660_v34  ;;  %789 = vperm.xlu1 %1060, %v1162_v0   ;;  %v836_v34 = vld [vmem:[%s1593_s4] sm:$0xf] }
  0xc9   : > { %v672_v50 = vmul.f32 %v668_v33, %v665_v44  ;;  %v671_v58 = vmul.f32 %v667_v41, %v664_v42 }
  0xcb   : > { %675 = vrot.lane.b32.xlu2 %v672_v50, %s1088_s12  ;;  %v1377_v4 = vpop.permute.xlu0 %682 }
  0xce   : > { %v1379_v3 = vpop.permute.xlu1 %698 }
  0xcf   : > { %v707_v18 = vpop.permute.xlu2 %706  ;;  %713 = vrot.lane.b32.xlu0 %v671_v58, %s1093_s14 }
  0xd0   : > { %v1373_v60 = vmul.f32 %v707_v18, %v671_v58  ;;  %v1375_v63 = vmul.f32 %v707_v18, %v672_v50  ;;  %673 = vrot.lane.b32.xlu1 %v671_v58, %s1088_s12 }
  0xd1   : > { %1062 = vset.pattern.permute.xlu1 %v1109_v17 }
  0xd3   : > { %691 = vrot.lane.b32.xlu2 %v672_v50, %s1091_s13  ;;  %v751_v13 = vpop.permute.xlu0 %750 }
  0xd6   : > { %v753_v12 = vpop.permute.xlu1 %752 }
  0xd7   : > { %731 = vrot.lane.b32.xlu0 %v672_v50, %s1095_s15  ;;  %v755_v19 = vsel %vm754_vm15, %v751_v13, %v753_v12  ;;  %v756_v10 = vsel %vm754_vm15, %v753_v12, %v751_v13 }
  0xd8   : > { %689 = vrot.lane.b32.xlu1 %v671_v58, %s1091_s13  ;;  %v1390_v30 = vmul.f32 %v758_v15, %v755_v19  ;;  %v1392_v48 = vmul.f32 %v759_v16, %v756_v10  ;;  %v1419_v33 = vpop.permute.xlu2 %722 }
  0xdb   : > { %729 = vrot.lane.b32.xlu2 %v671_v58, %s1095_s15 }
  0xde   : > { %v1410_v31 = vpop.permute.xlu1 %738 }
  0xdf   : > { %766 = vrot.lane.b32.xlu0 %v1392_v48, %s1088_s12 }
  0xe0   : > { %715 = vrot.lane.b32.xlu1 %v672_v50, %s1093_s14 }
  0xe3   : > { %764 = vrot.lane.b32.xlu2 %v1390_v30, %s1088_s12  ;;  %s318_s12 = scalar_lea.vmem %s1596_s7, %s986_s9 }
  0xe7   : > { %782 = vrot.lane.b32.xlu0 %v1392_v48, %s1091_s13  ;;  %v1425_v40 = vpop.permute.xlu1 %773 }
  0xe8   : > { %806 = vrot.lane.b32.xlu1 %v1392_v48, %s1093_s14 }
  0xeb   : > { %780 = vrot.lane.b32.xlu2 %v1390_v30, %s1091_s13 }
  0xef   : > { %804 = vrot.lane.b32.xlu0 %v1390_v30, %s1093_s14 }
  0xf0   : > { %813 = vperm.xlu1 %1062, %v1162_v0  }
  0xf3   : > { %820 = vrot.lane.b32.xlu2 %v1390_v30, %s1095_s15 }
  0xf7   : > { %822 = vrot.lane.b32.xlu0 %v1392_v48, %s1095_s15 }
  0xf8   : > { %1065 = vset.pattern.permute.xlu1 %v1077_v1  ;;  %v393_v1 = vpop.permute.xlu2 %392 }
  0xf9   : > { %855 = vperm.xlu1 %1065, %v852_v32  }
  0xfb   : > { %829 = vperm.xlu2 %1063, %v1162_v0   ;;  %v892_v0 = vld [vmem:[%s1595_s6] sm:$0x3f] }
  0xff   : > { %839 = vperm.xlu0 %1064, %v836_v34  }
 0x100   : > { %v486_v44 = vpop.permute.xlu2 %485 }
 0x101   : > { %1067 = vset.pattern.permute.xlu1 %v1079_v5 }
 0x102   : > { %873 = vperm.xlu1 %1067, %v852_v32  }
 0x103   : > { %1066 = vset.pattern.permute.xlu2 %v1078_v2 }
 0x104   : > { %863 = vperm.xlu2 %1066, %v852_v32  }
 0x107   : > { %895 = vperm.xlu0 %1064, %v892_v0  }
 0x108   : > { %v502_v12 = vpop.permute.xlu2 %501 }
 0x109   : > { %v395_v41 = vpop.permute.xlu0 %394 }
 0x10a   : > { %v372_v42 = vpop.permute.xlu1 %371  ;;  %v397_v58 = vsel %vm396_vm7, %v393_v1, %v395_v41  ;;  %v398_v18 = vsel %vm396_vm7, %v395_v41, %v393_v1 }
 0x10b   : > { %v404_v15 = vmul.f32 %v1304_v37, %v398_v18  ;;  %v405_v16 = vmul.f32 %v1306_v38, %v397_v58 }
 0x10c   : > { %1068 = vset.pattern.permute.xlu2 %v1082_v9 }
 0x10d   : > { %883 = vperm.xlu2 %1068, %v852_v32   ;;  %v410_v34 = vmul.f32 %v1229_v46, %v404_v15  ;;  %v411_v0 = vmul.f32 %v1229_v46, %v405_v16 }
 0x111   : > { %v423_v47 = vpop.permute.xlu0 %422 }
 0x112   : > { %v374_v2 = vpop.permute.xlu1 %373 }
 0x113   : > { %v376_v50 = vsel %vm375_vm5, %v372_v42, %v374_v2  ;;  %v377_v5 = vsel %vm375_vm5, %v374_v2, %v372_v42 }
 0x114   : > { %v383_v9 = vmul.f32 %v1283_v25, %v377_v5  ;;  %v384_v17 = vmul.f32 %v1285_v26, %v376_v50 }
 0x116   : > { %v390_v53 = vmul.f32 %v1218_v39, %v383_v9  ;;  %v391_v32 = vmul.f32 %v1218_v39, %v384_v17  ;;  %v1460_v9 = vpop.permute.xlu2 %797 }
 0x118   : > { %v412_v42 = vadd.f32 %v410_v34, %v390_v53  ;;  %v413_v2 = vadd.f32 %v411_v0, %v391_v32 }
 0x119   : > { %v445_v11 = vpop.permute.xlu0 %444 }
 0x11a   : > { %v425_v13 = vpop.permute.xlu1 %424  ;;  %v421_v16 = vadd.f32 %v1254_v6, %v413_v2 }
 0x11b   : > { %v427_v19 = vsel %vm426_vm9, %v423_v47, %v425_v13  ;;  %v428_v10 = vsel %vm426_vm9, %v425_v13, %v423_v47 }
 0x11c   : > { %v434_v1 = vmul.f32 %v1327_v61, %v427_v19  ;;  %v435_v41 = vmul.f32 %v1329_v62, %v428_v10 }
 0x11e   : > { %v440_v58 = vmul.f32 %v1223_v43, %v434_v1  ;;  %v441_v47 = vmul.f32 %v1223_v43, %v435_v41  ;;  %v420_v43 = vadd.f32 %v1256_v7, %v412_v42 }
 0x120   : > { %v442_v10 = vadd.f32 %v440_v58, %v420_v43  ;;  %v443_v53 = vadd.f32 %v441_v47, %v421_v16 }
 0x121   : > { %v488_v50 = vpop.permute.xlu0 %487 }
 0x122   : > { %v447_v5 = vpop.permute.xlu1 %446  ;;  %v489_v46 = vsel %vm375_vm5, %v486_v44, %v488_v50  ;;  %v490_v17 = vsel %vm375_vm5, %v488_v50, %v486_v44 }
 0x123   : > { %v449_v18 = vsel %vm448_vm11, %v445_v11, %v447_v5  ;;  %v450_v39 = vsel %vm448_vm11, %v447_v5, %v445_v11  ;;  %v491_v32 = vmul.f32 %v490_v17, %v1283_v25  ;;  %v492_v34 = vmul.f32 %v489_v46, %v1285_v26 }
 0x124   : > { %v456_v13 = vmul.f32 %v1353_v28, %v449_v18  ;;  %v457_v15 = vmul.f32 %v1355_v29, %v450_v39 }
 0x125   : > { %v497_v42 = vmul.f32 %v1237_v49, %v491_v32  ;;  %v676_v5 = vpop.permute.xlu2 %675 }
 0x126   : > { %v462_v19 = vmul.f32 %v1227_v45, %v456_v13  ;;  %v463_v11 = vmul.f32 %v1227_v45, %v457_v15  ;;  %v498_v45 = vmul.f32 %v1237_v49, %v492_v34 }
 0x128   : > { %v464_v0 = vadd.f32 %v462_v19, %v442_v10  ;;  %v465_v44 = vadd.f32 %v463_v11, %v443_v53 }
 0x129   : > { %v504_v1 = vpop.permute.xlu0 %503 }
 0x12a   : > { %v505_v41 = vsel %vm396_vm7, %v502_v12, %v504_v1  ;;  %v506_v7 = vsel %vm396_vm7, %v504_v1, %v502_v12  ;;  %v528_v6 = vpop.permute.xlu1 %527  ;;  %v499_v58 = vadd.f32 %v497_v42, %v464_v0  ;;  %v500_v47 = vadd.f32 %v498_v45, %v465_v44 }
 0x12b   : > { %v507_v2 = vmul.f32 %v506_v7, %v1304_v37  ;;  %v508_v50 = vmul.f32 %v505_v41, %v1306_v38 }
 0x12d   : > { %v513_v18 = vmul.f32 %v1264_v14, %v507_v2  ;;  %v514_v39 = vmul.f32 %v1264_v14, %v508_v50  ;;  %v692_v10 = vpop.permute.xlu2 %691 }
 0x12f   : > { %v515_v46 = vadd.f32 %v513_v18, %v499_v58  ;;  %v516_v17 = vadd.f32 %v514_v39, %v500_v47  ;;  %v608_v18 = vmul.f32 %v1195_v22, %v1325_v59  ;;  %v609_v39 = vmul.f32 %v1197_v23, %v1325_v59 }
 0x131   : > { %v526_v13 = vpop.permute.xlu0 %525  ;;  %v523_v12 = vadd.f32 %v1276_v20, %v515_v46  ;;  %v524_v15 = vadd.f32 %v1279_v21, %v516_v17 }
 0x132   : > { %v529_v49 = vsel %vm426_vm9, %v526_v13, %v528_v6  ;;  %v530_v43 = vsel %vm426_vm9, %v528_v6, %v526_v13  ;;  %v544_v16 = vpop.permute.xlu1 %543 }
 0x133   : > { %v531_v19 = vmul.f32 %v529_v49, %v1327_v61  ;;  %v532_v11 = vmul.f32 %v530_v43, %v1329_v62 }
 0x135   : > { %v537_v14 = vmul.f32 %v1243_v55, %v531_v19  ;;  %v538_v53 = vmul.f32 %v1243_v55, %v532_v11  ;;  %v730_v45 = vpop.permute.xlu2 %729 }
 0x137   : > { %v539_v1 = vadd.f32 %v537_v14, %v523_v12  ;;  %v540_v41 = vadd.f32 %v538_v53, %v524_v15 }
 0x139   : > { %v542_v32 = vpop.permute.xlu0 %541 }
 0x13a   : > { %v545_v20 = vsel %vm448_vm11, %v542_v32, %v544_v16  ;;  %v546_v21 = vsel %vm448_vm11, %v544_v16, %v542_v32  ;;  %v1498_v34 = vpop.permute.xlu1 %789 }
 0x13b   : > { %v547_v0 = vmul.f32 %v545_v20, %v1353_v28  ;;  %v548_v44 = vmul.f32 %v546_v21, %v1355_v29 }
 0x13d   : > { %v553_v7 = vmul.f32 %v1259_v8, %v547_v0  ;;  %v554_v6 = vmul.f32 %v1259_v8, %v548_v44  ;;  %v765_v49 = vpop.permute.xlu2 %764 }
 0x13f   : > { %v555_v55 = vadd.f32 %v553_v7, %v539_v1  ;;  %v556_v42 = vadd.f32 %v554_v6, %v540_v41 }
 0x141   : > { %v576_v2 = vadd.f32 %v1295_v35, %v555_v55  ;;  %v577_v50 = vadd.f32 %v1297_v36, %v556_v42  ;;  %v714_v58 = vpop.permute.xlu0 %713 }
 0x142   : > { %v674_v47 = vpop.permute.xlu1 %673 }
 0x143   : > { %v597_v46 = vadd.f32 %v1315_v54, %v576_v2  ;;  %v598_v17 = vadd.f32 %v1317_v56, %v577_v50  ;;  %v677_v12 = vsel %vm375_vm5, %v674_v47, %v676_v5  ;;  %v678_v35 = vsel %vm375_vm5, %v676_v5, %v674_v47 }
 0x144   : > { %v679_v54 = vmul.f32 %v678_v35, %v1283_v25  ;;  %v680_v56 = vmul.f32 %v677_v12, %v1285_v26 }
 0x145   : > { %v610_v8 = vadd.f32 %v608_v18, %v597_v46  ;;  %v611_v13 = vadd.f32 %v609_v39, %v598_v17  ;;  %v781_v7 = vpop.permute.xlu2 %780 }
 0x147   : > { %v631_v36 = vadd.f32 %v1349_v24, %v610_v8  ;;  %v632_v15 = vadd.f32 %v1351_v27, %v611_v13  ;;  %v685_v24 = vmul.f32 %v1377_v4, %v679_v54  ;;  %v686_v27 = vmul.f32 %v1377_v4, %v680_v56 }
 0x149   : > { %v652_v22 = vadd.f32 %v1365_v51, %v631_v36  ;;  %v653_v23 = vadd.f32 %v1367_v57, %v632_v15  ;;  %v732_v59 = vpop.permute.xlu0 %731 }
 0x14a   : > { %v690_v43 = vpop.permute.xlu1 %689  ;;  %v734_v0 = vsel %vm448_vm11, %v732_v59, %v730_v45 }
 0x14b   : > { %v693_v16 = vsel %vm396_vm7, %v690_v43, %v692_v10  ;;  %v694_v5 = vsel %vm396_vm7, %v692_v10, %v690_v43  ;;  %v687_v19 = vadd.f32 %v685_v24, %v652_v22  ;;  %v688_v11 = vadd.f32 %v686_v27, %v653_v23 }
 0x14c   : > { %v695_v51 = vmul.f32 %v694_v5, %v1304_v37  ;;  %v696_v57 = vmul.f32 %v693_v16, %v1306_v38  ;;  %v733_v10 = vsel %vm448_vm11, %v730_v45, %v732_v59  ;;  %v736_v45 = vmul.f32 %v734_v0, %v1355_v29 }
 0x14d   : > { %v735_v42 = vmul.f32 %v733_v10, %v1353_v28  ;;  %v821_v56 = vpop.permute.xlu2 %820  ;;  %v800_v59 = vmul.f32 %v1460_v9, %v1390_v30 }
 0x14e   : > { %v701_v14 = vmul.f32 %v1379_v3, %v695_v51  ;;  %v702_v53 = vmul.f32 %v1379_v3, %v696_v57 }
 0x14f   : > { %v741_v39 = vmul.f32 %v1410_v31, %v735_v42 }
 0x150   : > { %v703_v32 = vadd.f32 %v701_v14, %v687_v19  ;;  %v704_v20 = vadd.f32 %v702_v53, %v688_v11 }
 0x151   : > { %v767_v21 = vpop.permute.xlu0 %766 }
 0x152   : > { %v716_v4 = vpop.permute.xlu1 %715  ;;  %v768_v44 = vsel %vm375_vm5, %v765_v49, %v767_v21  ;;  %v769_v1 = vsel %vm375_vm5, %v767_v21, %v765_v49  ;;  %v711_v41 = vadd.f32 %v1373_v60, %v703_v32  ;;  %v712_v3 = vadd.f32 %v1375_v63, %v704_v20 }
 0x153   : > { %v717_v6 = vsel %vm426_vm9, %v714_v58, %v716_v4  ;;  %v718_v55 = vsel %vm426_vm9, %v716_v4, %v714_v58  ;;  %v770_v47 = vmul.f32 %v769_v1, %v1283_v25  ;;  %v771_v60 = vmul.f32 %v768_v44, %v1285_v26  ;;  %v846_v1 = vld.sshfl [vmem:[#allocation1] sm:$0xff pattern:$0x75316420] }
 0x154   : > { %v719_v2 = vmul.f32 %v717_v6, %v1327_v61  ;;  %v720_v50 = vmul.f32 %v718_v55, %v1329_v62  ;;  %v742_v58 = vmul.f32 %v1410_v31, %v736_v45  ;;  %v801_v49 = vmul.f32 %v1460_v9, %v1392_v48 }
 0x155   : > { %v776_v13 = vmul.f32 %v1425_v40, %v770_v47  ;;  %v777_v12 = vmul.f32 %v1425_v40, %v771_v60  ;;  %v830_v30 = vpop.permute.xlu2 %829 }
 0x156   : > { %v725_v63 = vmul.f32 %v1419_v33, %v719_v2  ;;  %v726_v18 = vmul.f32 %v1419_v33, %v720_v50 }
 0x158   : > { %v727_v46 = vadd.f32 %v725_v63, %v711_v41  ;;  %v728_v17 = vadd.f32 %v726_v18, %v712_v3  ;;  %v847_v41 = vld.sshfl [vmem:[#allocation1 + $0x8] sm:$0xff pattern:$0x75316420] }
 0x159   : > { %v783_v8 = vpop.permute.xlu0 %782 }
 0x15a   : > { %v784_v25 = vsel %vm396_vm7, %v781_v7, %v783_v8  ;;  %v785_v26 = vsel %vm396_vm7, %v783_v8, %v781_v7  ;;  %v743_v35 = vadd.f32 %v741_v39, %v727_v46  ;;  %v744_v36 = vadd.f32 %v742_v58, %v728_v17  ;;  %v807_v40 = vpop.permute.xlu1 %806 }
 0x15b   : > { %v786_v33 = vmul.f32 %v785_v26, %v1304_v37  ;;  %v787_v15 = vmul.f32 %v784_v25, %v1306_v38 }
 0x15c   : > { %v778_v31 = vadd.f32 %v776_v13, %v743_v35  ;;  %v779_v22 = vadd.f32 %v777_v12, %v744_v36 }
 0x15d   : > { %v792_v23 = vmul.f32 %v1498_v34, %v786_v33  ;;  %v793_v54 = vmul.f32 %v1498_v34, %v787_v15 }
 0x15e   : > { %v864_v44 = vpop.permute.xlu2 %863 }
 0x15f   : > { %v794_v43 = vadd.f32 %v792_v23, %v778_v31  ;;  %v795_v16 = vadd.f32 %v793_v54, %v779_v22 }
 0x161   : > { %v805_v5 = vpop.permute.xlu0 %804  ;;  %v802_v37 = vadd.f32 %v800_v59, %v794_v43  ;;  %v803_v24 = vadd.f32 %v801_v49, %v795_v16 }
 0x162   : > { %v808_v38 = vsel %vm426_vm9, %v805_v5, %v807_v40  ;;  %v809_v27 = vsel %vm426_vm9, %v807_v40, %v805_v5  ;;  %v814_v57 = vpop.permute.xlu1 %813 }
 0x163   : > { %v810_v34 = vmul.f32 %v808_v38, %v1327_v61  ;;  %v811_v51 = vmul.f32 %v809_v27, %v1329_v62 }
 0x165   : > { %v816_v19 = vmul.f32 %v814_v57, %v810_v34  ;;  %v817_v11 = vmul.f32 %v814_v57, %v811_v51 }
 0x167   : > { %v818_v20 = vadd.f32 %v816_v19, %v802_v37  ;;  %v819_v21 = vadd.f32 %v817_v11, %v803_v24  ;;  %v884_v17 = vpop.permute.xlu2 %883 }
 0x169   : > { %v823_v48 = vpop.permute.xlu0 %822 }
 0x16a   : > { %v824_v9 = vsel %vm448_vm11, %v821_v56, %v823_v48  ;;  %v825_v14 = vsel %vm448_vm11, %v823_v48, %v821_v56 }
 0x16b   : > { %v826_v53 = vmul.f32 %v824_v9, %v1353_v28  ;;  %v827_v32 = vmul.f32 %v825_v14, %v1355_v29  ;;  %v856_v62 = vpop.permute.xlu1 %855 }
 0x16d   : > { %v832_v61 = vmul.f32 %v830_v30, %v826_v53  ;;  %v833_v10 = vmul.f32 %v830_v30, %v827_v32 }
 0x16f   : > { %v834_v0 = vadd.f32 %v832_v61, %v818_v20  ;;  %v835_v4 = vadd.f32 %v833_v10, %v819_v21 }
 0x171   : > { %v840_v3 = vpop.permute.xlu0 %839 }
 0x172   : > { %v842_v7 = vadd.f32 %v840_v3, %v834_v0  ;;  %v843_v6 = vadd.f32 %v840_v3, %v835_v4 }
 0x174   : > { %v850_v55 = vadd.f32 %v846_v1, %v842_v7  ;;  %v851_v52 = vadd.f32 %v847_v41, %v843_v6  ;;  %v874_v47 = vpop.permute.xlu1 %873 }
 0x176   : > { %v858_v42 = vperm.slane %v850_v55, 0  ;;  %v859_v45 = vperm.slane %v851_v52, 0  ;;  %v866_v28 = vperm.slane %v850_v55, 1  ;;  %v867_v2 = vperm.slane %v851_v52, 1 }
 0x177   : > { %v876_v29 = vperm.slane %v850_v55, 2  ;;  %v877_v50 = vperm.slane %v851_v52, 2  ;;  %v886_v18 = vperm.slane %v850_v55, 3  ;;  %v887_v39 = vperm.slane %v851_v52, 3 }
 0x178   : > { %v860_v60 = vmul.f32 %v858_v42, %v856_v62  ;;  %v861_v63 = vmul.f32 %v859_v45, %v856_v62  ;;  %v868_v58 = vmul.f32 %v866_v28, %v864_v44  ;;  %v869_v46 = vmul.f32 %v867_v2, %v864_v44 }
 0x179   : > { %v878_v12 = vmul.f32 %v876_v29, %v874_v47  ;;  %v879_v25 = vmul.f32 %v877_v50, %v874_v47  ;;  %v888_v26 = vmul.f32 %v886_v18, %v884_v17  ;;  %v889_v35 = vmul.f32 %v887_v39, %v884_v17  ;;  %v896_v22 = vpop.permute.xlu0 %895 }
 0x17a   : > { %v870_v8 = vadd.f32 %v868_v58, %v860_v60  ;;  %v871_v13 = vadd.f32 %v869_v46, %v861_v63 }
 0x17c   : > { %v880_v36 = vadd.f32 %v878_v12, %v870_v8  ;;  %v881_v33 = vadd.f32 %v879_v25, %v871_v13 }
 0x17e   : > { %v890_v15 = vadd.f32 %v888_v26, %v880_v36  ;;  %v891_v31 = vadd.f32 %v889_v35, %v881_v33 }
 0x180   : > { %v898_v23 = vadd.f32 %v896_v22, %v890_v15  ;;  %v899_v54 = vadd.f32 %v896_v22, %v891_v31 }
 0x182   : > { %900 = vst [vmem:[%s318_s12] sm:$0x3f] %v898_v23 }
 0x183   : > { %901 = vst [vmem:[%s318_s12 + $0x8] sm:$0x3f] %v899_v54 }
 0x184 PF: > { %s17_s24 = sadd.s32 1, %s1075_s24  }
 0x185   : > { %p14_p4 = scmp.ge.s32.totalorder %s17_s24, 4  }
 0x187   :  { %16 = sbr.rel (!%p14_p4) target bundleno = 1 (0x1), region = 84 }

</bundles_post_ra>
